<compile_context>
chip_gen: v7x
topology: tpu7x:2x2x1
jax: 0.10.0
libtpu: 0.0.40
codegen_flags: <defaults>
</compile_context>

<pallas_src>
import math

import jax
import jax.numpy as jnp
from jax.experimental import pallas as pl
from jax.experimental.pallas import tpu as pltpu


def _get_pad(size: int, multiple: int):
    new_size = math.ceil(size / multiple) * multiple
    pad = new_size - size
    left = pad // 2
    return left, pad - left


def _round_up(x: int, m: int) -> int:
    return ((x + m - 1) // m) * m


def _num_tensorcores_per_chip() -> int:
    """Best-effort detection of multi-TensorCore chips (v4/v5p/v7x)."""
    try:
        kind = jax.devices()[0].device_kind.lower()
    except Exception:
        return 1
    return 2 if any(t in kind for t in ("v4", "v5p", "v7", "7x")) else 1


def _choose_block_planes(num_planes: int, per_plane_bytes: int,
                         target_bytes: int, min_steps: int) -> int:
    """Largest divisor B of num_planes with B*(in+out) <= target_bytes while
    keeping at least `min_steps` grid steps (multi-TC load balancing)."""
    best = 1
    need_steps = min(min_steps, num_planes)
    for b in range(1, num_planes + 1):
        if num_planes % b:
            continue
        if b * per_plane_bytes > target_bytes:
            continue
        if num_planes // b < need_steps:
            continue
        best = b
    return best


def _vmem_limit(in_block_bytes: int, out_block_bytes: int) -> int:
    """2x(double-buffered in+out block) plus headroom, clamped to [32, 64] MiB
    so it is safe on v7x's 64 MiB VMEM and never below the scoped default."""
    need = 2 * (in_block_bytes + out_block_bytes) + (8 << 20)
    return int(min(64 << 20, max(32 << 20, need)))


def center_padding(x: jax.Array, multiple: int, *,
                   row_tile: int | None = None,
                   block_bytes_target: int = 8 << 20) -> jax.Array:
    """Pallas implementation of CenterPadding.forward for 4-D NCHW input."""
    N, C, H, W = x.shape
    pad_top, pad_bot = _get_pad(H, multiple)
    pad_left, pad_right = _get_pad(W, multiple)
    H_out = H + pad_top + pad_bot
    W_out = W + pad_left + pad_right

    P = N * C
    itemsize = jnp.dtype(x.dtype).itemsize
    x_flat = x.reshape(P, H, W)                       # free, contiguous reshape

    cost = pl.CostEstimate(
        flops=0, transcendentals=0,
        bytes_accessed=int(P * (H * W + H_out * W_out) * itemsize))

    def _lane_pad(rows, dt):
        """Concat zero slabs on the lane axis -> one full-width row block."""
        if not (pad_left or pad_right):
            return rows
        nb, nr = rows.shape[0], rows.shape[1]
        parts = []
        if pad_left:
            parts.append(jnp.zeros((nb, nr, pad_left), dt))
        parts.append(rows)
        if pad_right:
            parts.append(jnp.zeros((nb, nr, pad_right), dt))
        return jnp.concatenate(parts, axis=-1)

    plane_bytes = (H * W + H_out * W_out) * itemsize
    multi_tc = _num_tensorcores_per_chip() > 1
    use_row_tiling = (row_tile is not None) or (plane_bytes > block_bytes_target)

    if not use_row_tiling:
        # ---- Path 1: whole padded plane(s) per block; assemble the entire
        # (B, H_out, W_out) tile in-register and issue a single store.
        min_steps = 4 if multi_tc else 1
        B = _choose_block_planes(P, plane_bytes, block_bytes_target, min_steps)

        def kernel(x_ref, o_ref):
            dt = o_ref.dtype
            rows = _lane_pad(x_ref[...], dt)                  # (B, H, W_out)
            parts = []
            if pad_top:
                parts.append(jnp.zeros((B, pad_top, W_out), dt))
            parts.append(rows)
            if pad_bot:
                parts.append(jnp.zeros((B, pad_bot, W_out), dt))
            tile = jnp.concatenate(parts, axis=1) if len(parts) > 1 else rows
            o_ref[...] = tile                                 # one full-tile store

        in_blk = B * H * W * itemsize
        out_blk = B * H_out * W_out * itemsize
        out_flat = pl.pallas_call(
            kernel,
            out_shape=jax.ShapeDtypeStruct((P, H_out, W_out), x.dtype),
            grid=(P // B,),
            in_specs=[pl.BlockSpec((B, H, W), lambda i: (i, 0, 0))],
            out_specs=pl.BlockSpec((B, H_out, W_out), lambda i: (i, 0, 0)),
            compiler_params=pltpu.CompilerParams(
                dimension_semantics=("parallel",),
                vmem_limit_bytes=_vmem_limit(in_blk, out_blk)),
            cost_estimate=cost,
        )(x_flat)
    else:
        # ---- Path 2: 2-D grid (plane, output-row tile).  The pad_top rows
        # straddling consecutive row tiles are carried in a small VMEM scratch
        # (row-tile axis is "arbitrary" = sequential), so each input row is
        # DMA'd exactly once despite the non-block-aligned H offset.
        if row_tile is not None:
            TH = int(row_tile)
        else:
            row_bytes = (W + W_out) * itemsize
            TH = max(8, (block_bytes_target // max(row_bytes, 1)) // 8 * 8)
        TH = max(TH, _round_up(pad_top + 1, 8))
        TH = min(TH, _round_up(H_out, 8))
        assert TH % 8 == 0 and TH > pad_top

        grid_h = pl.cdiv(H_out, TH)          # output row tiles (last may be ragged)
        n_in_blocks = pl.cdiv(H, TH)         # input row tiles (last may be ragged)

        def kernel(x_ref, o_ref, *scratch):
            j = pl.program_id(1)
            dt = o_ref.dtype
            blk = x_ref[...]                                  # (1, TH, W)
            if pad_top:
                carry_ref, = scratch
                top = carry_ref[...]                          # (1, pad_top, W)
                rows = jnp.concatenate([top, blk[:, : TH - pad_top, :]], axis=1)
                carry_ref[...] = blk[:, TH - pad_top:, :]     # carry for next tile
            else:
                rows = blk
            if pad_top or pad_bot:
                # Zero rows that fall outside the valid input range (top band,
                # bottom band, ragged-block garbage, first-tile stale carry).
                r = jax.lax.broadcasted_iota(jnp.int32, (1, TH, 1), 1)
                in_row = j * TH - pad_top + r
                valid = jnp.logical_and(in_row >= 0, in_row < H)
                rows = jnp.where(valid, rows, jnp.zeros((), dt))
            o_ref[...] = _lane_pad(rows, dt)                  # one full-width store

        scratch_shapes = ([pltpu.VMEM((1, pad_top, W), x.dtype)]
                          if pad_top else [])
        in_blk = TH * W * itemsize
        out_blk = TH * W_out * itemsize
        out_flat = pl.pallas_call(
            kernel,
            out_shape=jax.ShapeDtypeStruct((P, H_out, W_out), x.dtype),
            grid=(P, grid_h),
            in_specs=[pl.BlockSpec(
                (1, TH, W),
                lambda i, j: (i, jnp.minimum(j, n_in_blocks - 1), 0))],
            out_specs=pl.BlockSpec((1, TH, W_out), lambda i, j: (i, j, 0)),
            scratch_shapes=scratch_shapes,
            compiler_params=pltpu.CompilerParams(
                dimension_semantics=("parallel", "arbitrary"),
                vmem_limit_bytes=_vmem_limit(in_blk, out_blk)),
            cost_estimate=cost,
        )(x_flat)

    return out_flat.reshape(N, C, H_out, W_out)


def _reference(x, multiple):
    pt, pb = _get_pad(x.shape[2], multiple)
    pleft, pright = _get_pad(x.shape[3], multiple)
    return jnp.pad(x, ((0, 0), (0, 0), (pt, pb), (pleft, pright)))


if __name__ == "__main__":
    multiple = 14  # DINOv2 patch size; CenterPadding's only config.

    # 1) Main test: padding on both spatial dims (whole-plane path).
    x = jax.random.normal(jax.random.PRNGKey(0), (2, 4, 16, 16), jnp.float32)
    out = jax.block_until_ready(center_padding(x, multiple))
    ref = _reference(x, multiple)
    assert out.shape == ref.shape and out.dtype == x.dtype, (out.shape, ref.shape)
    assert jnp.array_equal(out, ref), "whole-plane path mismatch vs reference"

    # 2) Edge case: spatial dims already multiples of `multiple` (zero pad).
    x2 = jax.random.normal(jax.random.PRNGKey(1), (1, 2, 28, 28), jnp.float32)
    out2 = jax.block_until_ready(center_padding(x2, multiple))
    assert jnp.array_equal(out2, _reference(x2, multiple)), "zero-pad case mismatch"

    # 3) Row-tiled path (forced small tile): exercises the carry straddle,
    #    ragged first/last tiles and the clamped input index map.
    x3 = jax.random.normal(jax.random.PRNGKey(2), (1, 3, 30, 33), jnp.float32)
    out3 = jax.block_until_ready(center_padding(x3, multiple, row_tile=16))
    assert out3.shape == _reference(x3, multiple).shape
    assert jnp.array_equal(out3, _reference(x3, multiple)), "row-tiled path mismatch"

    # 4) Sub-32-bit dtype (bf16), whole-plane path.
    x4 = jax.random.normal(jax.random.PRNGKey(3), (2, 2, 16, 20), jnp.bfloat16)
    out4 = jax.block_until_ready(center_padding(x4, multiple))
    assert jnp.array_equal(out4, _reference(x4, multiple)), "bf16 case mismatch"

    print("KERNEL_OK")
</pallas_src>

<mosaic_0001>
module attributes {stable_mosaic.version = 11 : i64} {
  func.func @kernel(%arg0: i32, %arg1: memref<8x16x16xf32, #tpu.memory_space<vmem>>, %arg2: memref<8x28x28xf32, #tpu.memory_space<vmem>>) attributes {dimension_semantics = [#tpu.dimension_semantics<parallel>], iteration_bounds = array<i64: 1>, scalar_prefetch = 0 : i64, scratch_operands = 0 : i64, tpu.core_type = #tpu.core_type<tc>, window_params = [{transform_indices = @transform_0, window_bounds = array<i64: 8, 16, 16>}, {transform_indices = @transform_1, window_bounds = array<i64: 8, 28, 28>}]} {
    %c0 = arith.constant 0 : index
    %c0_0 = arith.constant 0 : index
    %c0_1 = arith.constant 0 : index
    %0 = vector.load %arg1[%c0, %c0_0, %c0_1] : memref<8x16x16xf32, #tpu.memory_space<vmem>>, vector<8x16x16xf32>
    %cst = arith.constant 0.000000e+00 : f32
    %1 = vector.broadcast %cst : f32 to vector<8x16x6xf32>
    %cst_2 = arith.constant 0.000000e+00 : f32
    %2 = vector.broadcast %cst_2 : f32 to vector<8x16x6xf32>
    %3 = tpu.concatenate %1, %0, %2 in 2 : vector<8x16x6xf32>, vector<8x16x16xf32>, vector<8x16x6xf32> -> vector<8x16x28xf32>
    %cst_3 = arith.constant 0.000000e+00 : f32
    %4 = vector.broadcast %cst_3 : f32 to vector<8x6x28xf32>
    %cst_4 = arith.constant 0.000000e+00 : f32
    %5 = vector.broadcast %cst_4 : f32 to vector<8x6x28xf32>
    %6 = tpu.concatenate %4, %3, %5 in 1 : vector<8x6x28xf32>, vector<8x16x28xf32>, vector<8x6x28xf32> -> vector<8x28x28xf32>
    %c0_5 = arith.constant 0 : index
    %c0_6 = arith.constant 0 : index
    %c0_7 = arith.constant 0 : index
    %7 = vector.load %arg2[%c0_5, %c0_6, %c0_7] : memref<8x28x28xf32, #tpu.memory_space<vmem>>, vector<8x28x28xf32>
    tpu.vector_store %arg2[%c0_5, %c0_6, %c0_7], %6 {strides = array<i32>} : memref<8x28x28xf32, #tpu.memory_space<vmem>>, vector<8x28x28xf32>,
    return
  }
  func.func @transform_0(%arg0: i32) -> (i32, i32, i32) {
    %c0_i32 = arith.constant 0 : i32
    %c0_i32_0 = arith.constant 0 : i32
    %c0_i32_1 = arith.constant 0 : i32
    return %arg0, %c0_i32, %c0_i32_0 : i32, i32, i32
  }
  func.func @transform_1(%arg0: i32) -> (i32, i32, i32) {
    %c0_i32 = arith.constant 0 : i32
    %c0_i32_0 = arith.constant 0 : i32
    %c0_i32_1 = arith.constant 0 : i32
    return %arg0, %c0_i32, %c0_i32_0 : i32, i32, i32
  }
}

</mosaic_0001>

<bundles_post_ra>
// kernel: tpu_custom_call.1
= control target key start
LH: loop header
LB: loop body
LE: loop exit
PB: predicated region body
PF: predicated region fallthrough
CT: control target
= control target key end

     0   :  { %6 = vsyncpa [#allocation3], 0  ;;  %s285_s6 = smov [#allocation2]   ;;  %s488_s0 = inlined_call_operand.hbm [shape: f32[8,16,16], index: 0, kind: input, shape index: {}]   ;;  %s489_s1 = inlined_call_operand.vmem [shape: f32[8,28,28], index: 1, kind: output, shape index: {}]  }
   0x1   :  { %s12_s7 = sshll.u32 %s285_s6, 4  ;;  %s261_s10 = scalar_lea.hbm %s488_s0, 2048  ;;  %s13_s7 = int_to_ptr.vmem [resolvable:$true] %s12_s7 }
   0x2   :  { %p262_p0 = scmp.ne.s32.totalorder %s488_s0, %s261_s10  ;;  %p265_p1 = scmp.lt.u32.totalorder %s261_s10, %s488_s0 }
   0x4   :  { %p267_p2 = pnand %p265_p1, %p262_p0 }
   0x6   :  { %270 = shalt.err (!%p267_p2)
}
   0x7   :  { %s271_s15 = scalar_lea.vmem %s13_s7, 2048  ;;  %p276_p4 = scmp.lt.s32.totalorder %s13_s7, %s13_s7 }
   0x8   :  { %p272_p3 = scmp.ne.s32.totalorder %s13_s7, %s271_s15  ;;  %p277_p5 = scmp.lt.s32.totalorder %s271_s15, %s271_s15 }
   0xa   :  { %p278_p6 = por %p277_p5, %p276_p4 }
   0xc   :  { %p279_p7 = pnand %p278_p6, %p272_p3 }
   0xe   :  { %282 = shalt.err (!%p279_p7)
}
   0xf   :  { %s286_s16 = smov 128   ;;  %s287_s17 = smov 8  }
  0x10   :  { %18 = dma.hbm_to_vmem [thread:$0]  %s488_s0, 2048, %s13_s7, [#allocation3], %s286_s16, %s286_s16, %s287_s17  }
  0x11   :  { %283 = dma.done.wait [#allocation3], 2048  }
  0x12   :  { %284 = vsyncadd [#allocation3], 4294965248  ;;  %vm221_vm0 = vcmask 224256   ;;  %v288_v0 = vmov 0.0   ;;  %v24_v1 = vld [vmem:[#allocation2 + $0x10] sm:$0xff]  ;;  %v22_v2 = vld [vmem:[#allocation2] sm:$0xff] }
  0x13   :  { %222 = vst.msk [vmem:[%s489_s1 + $0x18] sm:$0xf] %vm221_vm0, %v288_v0  ;;  %226 = vst.msk [vmem:[%s489_s1 + $0x38] sm:$0xf] %vm221_vm0, %v288_v0  ;;  %s289_s6 = smov 6   ;;  %v25_v3 = vld [vmem:[#allocation2 + $0x18] sm:$0xff] }
  0x14   :  { %230 = vst.msk [vmem:[%s489_s1 + $0x58] sm:$0xf] %vm221_vm0, %v288_v0  ;;  %234 = vst.msk [vmem:[%s489_s1 + $0x78] sm:$0xf] %vm221_vm0, %v288_v0  ;;  %58 = vrot.lane.b32.xlu1 %v24_v1, %s289_s6  ;;  %54 = vrot.lane.b32.xlu0 %v22_v2, %s289_s6  ;;  %v23_v4 = vld [vmem:[#allocation2 + $0x8] sm:$0xff]  ;;  %v26_v6 = vld [vmem:[#allocation2 + $0x20] sm:$0xff] }
  0x15   :  { %238 = vst.msk [vmem:[%s489_s1 + $0x98] sm:$0xf] %vm221_vm0, %v288_v0  ;;  %242 = vst.msk [vmem:[%s489_s1 + $0xb8] sm:$0xf] %vm221_vm0, %v288_v0  ;;  %v27_v5 = vld [vmem:[#allocation2 + $0x28] sm:$0xff]  ;;  %v29_v7 = vld [vmem:[#allocation2 + $0x38] sm:$0xff] }
  0x16   :  { %246 = vst.msk [vmem:[%s489_s1 + $0xd8] sm:$0xf] %vm221_vm0, %v288_v0  ;;  %250 = vst.msk [vmem:[%s489_s1 + $0xf8] sm:$0xf] %vm221_vm0, %v288_v0  ;;  %v28_v8 = vld [vmem:[#allocation2 + $0x30] sm:$0xff]  ;;  %v31_v9 = vld [vmem:[#allocation2 + $0x48] sm:$0xff] }
  0x17   :  { %v30_v10 = vld [vmem:[#allocation2 + $0x40] sm:$0xff]  ;;  %v33_v11 = vld [vmem:[#allocation2 + $0x58] sm:$0xff]  ;;  %v32_v12 = vld [vmem:[#allocation2 + $0x50] sm:$0xff]  ;;  %vm102_vm1 = vcmask 48128   ;;  %vm119_vm2 = vcmask 179200   ;;  %vm152_vm3 = vcmask 1045504  }
  0x18   :  { %60 = vrot.lane.b32.xlu1 %v25_v3, %s289_s6  ;;  %56 = vrot.lane.b32.xlu0 %v23_v4, %s289_s6  ;;  %v35_v13 = vld [vmem:[#allocation2 + $0x68] sm:$0xff]  ;;  %v34_v14 = vld [vmem:[#allocation2 + $0x60] sm:$0xff]  ;;  %v37_v15 = vld [vmem:[#allocation2 + $0x78] sm:$0xff]  ;;  %vm217_vm4 = vcmask 228352  }
  0x19   :  { %v36_v16 = vld [vmem:[#allocation2 + $0x70] sm:$0xff] }
  0x1c   :  { %64 = vrot.lane.b32.xlu1 %v27_v5, %s289_s6  ;;  %62 = vrot.lane.b32.xlu0 %v26_v6, %s289_s6 }
  0x20   :  { %68 = vrot.lane.b32.xlu1 %v29_v7, %s289_s6  ;;  %66 = vrot.lane.b32.xlu0 %v28_v8, %s289_s6 }
  0x24   :  { %72 = vrot.lane.b32.xlu1 %v31_v9, %s289_s6  ;;  %70 = vrot.lane.b32.xlu0 %v30_v10, %s289_s6 }
  0x28   :  { %76 = vrot.lane.b32.xlu1 %v33_v11, %s289_s6  ;;  %74 = vrot.lane.b32.xlu0 %v32_v12, %s289_s6 }
  0x2c   :  { %80 = vrot.lane.b32.xlu1 %v35_v13, %s289_s6  ;;  %78 = vrot.lane.b32.xlu0 %v34_v14, %s289_s6 }
  0x30   :  { %84 = vrot.lane.b32.xlu1 %v37_v15, %s289_s6  ;;  %82 = vrot.lane.b32.xlu0 %v36_v16, %s289_s6 }
  0x86   :  { %v59_v17 = vpop.permute.xlu1 %58  ;;  %v55_v18 = vpop.permute.xlu0 %54 }
  0x87   :  { %v105_v19 = vsel %vm102_vm1, 0.0, %v59_v17  ;;  %v103_v20 = vsel %vm102_vm1, 0.0, %v55_v18 }
  0x88   :  { %v122_v21 = vsel %vm119_vm2, %v105_v19, 0.0  ;;  %v120_v22 = vsel %vm119_vm2, %v103_v20, 0.0 }
  0x89   :  { %v156_v23 = vrot.slane %v122_v21, 2  ;;  %v153_v24 = vrot.slane %v120_v22, 2 }
  0x8a   :  { %v61_v25 = vpop.permute.xlu1 %60  ;;  %v57_v26 = vpop.permute.xlu0 %56 }
  0x8b   :  { %v202_v27 = vsel %vm152_vm3, 0.0, %v156_v23  ;;  %v201_v28 = vsel %vm152_vm3, 0.0, %v153_v24  ;;  %v106_v29 = vsel %vm102_vm1, 0.0, %v61_v25  ;;  %v104_v30 = vsel %vm102_vm1, 0.0, %v57_v26 }
  0x8c   :  { %223 = vst.msk [vmem:[%s489_s1 + $0x20] sm:$0xff] %vm217_vm4, %v202_v27  ;;  %218 = vst.msk [vmem:[%s489_s1] sm:$0xff] %vm217_vm4, %v201_v28  ;;  %v123_v31 = vsel %vm119_vm2, %v106_v29, 0.0  ;;  %v121_v32 = vsel %vm119_vm2, %v104_v30, 0.0 }
  0x8d   :  { %v157_v33 = vrot.slane %v123_v31, 2  ;;  %v154_v34 = vrot.slane %v121_v32, 2 }
  0x8e   :  { %v65_v35 = vpop.permute.xlu1 %64  ;;  %v63_v36 = vpop.permute.xlu0 %62 }
  0x8f   :  { %v158_v37 = vsel %vm152_vm3, %v156_v23, %v157_v33  ;;  %v210_v38 = vsel %vm152_vm3, %v157_v33, 0.0  ;;  %v155_v39 = vsel %vm152_vm3, %v153_v24, %v154_v34  ;;  %v209_v40 = vsel %vm152_vm3, %v154_v34, 0.0 }
  0x90   :  { %224 = vst.msk [vmem:[%s489_s1 + $0x28] sm:$0xff] %vm217_vm4, %v158_v37  ;;  %225 = vst.msk [vmem:[%s489_s1 + $0x30] sm:$0xff] %vm217_vm4, %v210_v38  ;;  %v108_v41 = vsel %vm102_vm1, 0.0, %v65_v35  ;;  %v107_v42 = vsel %vm102_vm1, 0.0, %v63_v36 }
  0x91   :  { %219 = vst.msk [vmem:[%s489_s1 + $0x8] sm:$0xff] %vm217_vm4, %v155_v39  ;;  %220 = vst.msk [vmem:[%s489_s1 + $0x10] sm:$0xff] %vm217_vm4, %v209_v40  ;;  %v125_v43 = vsel %vm119_vm2, %v108_v41, 0.0  ;;  %v124_v44 = vsel %vm119_vm2, %v107_v42, 0.0 }
  0x92   :  { %v160_v45 = vrot.slane %v125_v43, 2  ;;  %v159_v46 = vrot.slane %v124_v44, 2  ;;  %v69_v47 = vpop.permute.xlu1 %68  ;;  %v67_v48 = vpop.permute.xlu0 %66 }
  0x93   :  { %v110_v49 = vsel %vm102_vm1, 0.0, %v69_v47  ;;  %v109_v50 = vsel %vm102_vm1, 0.0, %v67_v48 }
  0x94   :  { %v211_v51 = vsel %vm152_vm3, %v160_v45, 0.0  ;;  %v161_v52 = vsel %vm152_vm3, %v159_v46, %v160_v45  ;;  %v203_v53 = vsel %vm152_vm3, 0.0, %v159_v46  ;;  %v127_v54 = vsel %vm119_vm2, %v110_v49, 0.0 }
  0x95   :  { %229 = vst.msk [vmem:[%s489_s1 + $0x50] sm:$0xff] %vm217_vm4, %v211_v51  ;;  %227 = vst.msk [vmem:[%s489_s1 + $0x40] sm:$0xff] %vm217_vm4, %v203_v53  ;;  %v163_v55 = vrot.slane %v127_v54, 2  ;;  %v126_v56 = vsel %vm119_vm2, %v109_v50, 0.0 }
  0x96   :  { %228 = vst.msk [vmem:[%s489_s1 + $0x48] sm:$0xff] %vm217_vm4, %v161_v52  ;;  %v162_v57 = vrot.slane %v126_v56, 2  ;;  %v73_v58 = vpop.permute.xlu1 %72  ;;  %v71_v59 = vpop.permute.xlu0 %70 }
  0x97   :  { %v212_v60 = vsel %vm152_vm3, %v163_v55, 0.0  ;;  %v112_v61 = vsel %vm102_vm1, 0.0, %v73_v58  ;;  %v111_v62 = vsel %vm102_vm1, 0.0, %v71_v59 }
  0x98   :  { %233 = vst.msk [vmem:[%s489_s1 + $0x70] sm:$0xff] %vm217_vm4, %v212_v60  ;;  %v164_v63 = vsel %vm152_vm3, %v162_v57, %v163_v55  ;;  %v204_v0 = vsel %vm152_vm3, 0.0, %v162_v57  ;;  %v129_v1 = vsel %vm119_vm2, %v112_v61, 0.0  ;;  %v128_v2 = vsel %vm119_vm2, %v111_v62, 0.0 }
  0x99   :  { %231 = vst.msk [vmem:[%s489_s1 + $0x60] sm:$0xff] %vm217_vm4, %v204_v0  ;;  %232 = vst.msk [vmem:[%s489_s1 + $0x68] sm:$0xff] %vm217_vm4, %v164_v63  ;;  %v166_v3 = vrot.slane %v129_v1, 2  ;;  %v165_v4 = vrot.slane %v128_v2, 2 }
  0x9a   :  { %v77_v5 = vpop.permute.xlu1 %76  ;;  %v75_v6 = vpop.permute.xlu0 %74 }
  0x9b   :  { %v213_v7 = vsel %vm152_vm3, %v166_v3, 0.0  ;;  %v167_v8 = vsel %vm152_vm3, %v165_v4, %v166_v3  ;;  %v205_v9 = vsel %vm152_vm3, 0.0, %v165_v4  ;;  %v114_v10 = vsel %vm102_vm1, 0.0, %v77_v5 }
  0x9c   :  { %237 = vst.msk [vmem:[%s489_s1 + $0x90] sm:$0xff] %vm217_vm4, %v213_v7  ;;  %235 = vst.msk [vmem:[%s489_s1 + $0x80] sm:$0xff] %vm217_vm4, %v205_v9  ;;  %v131_v11 = vsel %vm119_vm2, %v114_v10, 0.0  ;;  %v113_v12 = vsel %vm102_vm1, 0.0, %v75_v6 }
  0x9d   :  { %236 = vst.msk [vmem:[%s489_s1 + $0x88] sm:$0xff] %vm217_vm4, %v167_v8  ;;  %v169_v13 = vrot.slane %v131_v11, 2  ;;  %v130_v14 = vsel %vm119_vm2, %v113_v12, 0.0 }
  0x9e   :  { %v168_v15 = vrot.slane %v130_v14, 2  ;;  %v81_v16 = vpop.permute.xlu1 %80  ;;  %v79_v17 = vpop.permute.xlu0 %78 }
  0x9f   :  { %v214_v18 = vsel %vm152_vm3, %v169_v13, 0.0  ;;  %v116_v19 = vsel %vm102_vm1, 0.0, %v81_v16  ;;  %v115_v20 = vsel %vm102_vm1, 0.0, %v79_v17 }
  0xa0   :  { %241 = vst.msk [vmem:[%s489_s1 + $0xb0] sm:$0xff] %vm217_vm4, %v214_v18  ;;  %v170_v21 = vsel %vm152_vm3, %v168_v15, %v169_v13  ;;  %v206_v22 = vsel %vm152_vm3, 0.0, %v168_v15  ;;  %v133_v23 = vsel %vm119_vm2, %v116_v19, 0.0  ;;  %v132_v24 = vsel %vm119_vm2, %v115_v20, 0.0 }
  0xa1   :  { %239 = vst.msk [vmem:[%s489_s1 + $0xa0] sm:$0xff] %vm217_vm4, %v206_v22  ;;  %240 = vst.msk [vmem:[%s489_s1 + $0xa8] sm:$0xff] %vm217_vm4, %v170_v21  ;;  %v172_v25 = vrot.slane %v133_v23, 2  ;;  %v171_v26 = vrot.slane %v132_v24, 2 }
  0xa2   :  { %v85_v27 = vpop.permute.xlu1 %84  ;;  %v83_v28 = vpop.permute.xlu0 %82 }
  0xa3   :  { %v215_v29 = vsel %vm152_vm3, %v172_v25, 0.0  ;;  %v173_v30 = vsel %vm152_vm3, %v171_v26, %v172_v25  ;;  %v207_v31 = vsel %vm152_vm3, 0.0, %v171_v26  ;;  %v118_v32 = vsel %vm102_vm1, 0.0, %v85_v27 }
  0xa4   :  { %245 = vst.msk [vmem:[%s489_s1 + $0xd0] sm:$0xff] %vm217_vm4, %v215_v29  ;;  %243 = vst.msk [vmem:[%s489_s1 + $0xc0] sm:$0xff] %vm217_vm4, %v207_v31  ;;  %v135_v33 = vsel %vm119_vm2, %v118_v32, 0.0  ;;  %v117_v34 = vsel %vm102_vm1, 0.0, %v83_v28 }
  0xa5   :  { %244 = vst.msk [vmem:[%s489_s1 + $0xc8] sm:$0xff] %vm217_vm4, %v173_v30  ;;  %v175_v35 = vrot.slane %v135_v33, 2  ;;  %v134_v36 = vsel %vm119_vm2, %v117_v34, 0.0 }
  0xa6   :  { %v174_v37 = vrot.slane %v134_v36, 2 }
  0xa7   :  { %v216_v38 = vsel %vm152_vm3, %v175_v35, 0.0 }
  0xa8   :  { %249 = vst.msk [vmem:[%s489_s1 + $0xf0] sm:$0xff] %vm217_vm4, %v216_v38  ;;  %v176_v39 = vsel %vm152_vm3, %v174_v37, %v175_v35  ;;  %v208_v40 = vsel %vm152_vm3, 0.0, %v174_v37 }
  0xa9   :  { %247 = vst.msk [vmem:[%s489_s1 + $0xe0] sm:$0xff] %vm217_vm4, %v208_v40  ;;  %248 = vst.msk [vmem:[%s489_s1 + $0xe8] sm:$0xff] %vm217_vm4, %v176_v39 }
  0xaa   :  { %255 = vsyncpa [#allocation3], 1 }

</bundles_post_ra>
